<compile_context>
chip_gen: v7x
topology: tpu7x:2x2x1
jax: 0.10.0
libtpu: 0.0.40
codegen_flags: <defaults>
</compile_context>

<pallas_src>
import functools

import jax
import jax.numpy as jnp
from jax.experimental import pallas as pl
from jax.experimental.pallas import tpu as pltpu

_SUBLANES = 8


def _round_up(x, m):
    return (x + m - 1) // m * m


def actor_kernel(x_ref, w1_ref, b1_ref, w2_ref, b2_ref, w3_ref, b3_ref, o_ref):
    """Fused 3-layer MLP: tanh(relu(relu(x@W1+b1)@W2+b2)@W3+b3).

    All MXU accumulation and the intermediate activations stay in f32; only
    the final store casts back to the output dtype."""
    x = x_ref[...]

    h1 = jnp.dot(x, w1_ref[...], preferred_element_type=jnp.float32)
    h1 = jnp.maximum(h1 + b1_ref[...].astype(jnp.float32), 0.0)

    h2 = jnp.dot(h1, w2_ref[...].astype(jnp.float32),
                 preferred_element_type=jnp.float32)
    h2 = jnp.maximum(h2 + b2_ref[...].astype(jnp.float32), 0.0)

    out = jnp.dot(h2, w3_ref[...].astype(jnp.float32),
                  preferred_element_type=jnp.float32)
    out = out + b3_ref[...].astype(jnp.float32)
    o_ref[...] = jnp.tanh(out).astype(o_ref.dtype)


@functools.partial(jax.jit, static_argnames=("block_rows",))
def actor_forward(state, w1, b1, w2, b2, w3, b3, *, block_rows=4096):
    batch, state_size = state.shape
    hidden1 = w1.shape[1]
    hidden2 = w2.shape[1]
    action_size = w3.shape[1]
    out_dtype = state.dtype
    itemsize = jnp.dtype(out_dtype).itemsize

    # --- batch tile: >=2 grid steps (v7x megacore), large enough to amortize
    # per-step grid overhead, capped by a VMEM guardrail. -------------------
    tm = min(block_rows, _round_up(pl.cdiv(batch, 2), _SUBLANES))
    # Per-row VMEM working set: double-buffered in/out DMA tiles plus f32
    # intermediates / elementwise temporaries for both hidden layers.
    bytes_per_row = (2 * (state_size + action_size) * itemsize
                     + 4 * (hidden1 + hidden2) * 4)
    max_tm = max(_SUBLANES,
                 (40 * 1024 * 1024 // bytes_per_row) // _SUBLANES * _SUBLANES)
    tm = max(_SUBLANES, min(tm, max_tm))
    # Ragged last tile is fine: OOB reads feed rows whose writes are dropped.
    grid = (pl.cdiv(batch, tm),)

    resident = lambda shape: pl.BlockSpec(shape, lambda i: (0, 0))

    weight_bytes = sum(a.size * a.dtype.itemsize
                       for a in (w1, b1, w2, b2, w3, b3))
    vmem_need = tm * bytes_per_row + 2 * weight_bytes
    vmem_limit = int(min(max(1.25 * vmem_need, 16 * 1024 * 1024),
                         48 * 1024 * 1024))

    flops = 2 * batch * (state_size * hidden1 + hidden1 * hidden2
                         + hidden2 * action_size)
    bytes_accessed = (state.size * state.dtype.itemsize + weight_bytes
                      + batch * action_size * itemsize)

    return pl.pallas_call(
        actor_kernel,
        out_shape=jax.ShapeDtypeStruct((batch, action_size), out_dtype),
        grid=grid,
        in_specs=[
            pl.BlockSpec((tm, state_size), lambda i: (i, 0)),  # state: tiled
            resident(w1.shape), resident(b1.shape),            # weights/biases:
            resident(w2.shape), resident(b2.shape),            #  VMEM-resident
            resident(w3.shape), resident(b3.shape),
        ],
        # action_size == full last dim -> (8,128) rule satisfied; unpadded,
        # contiguous HBM writeback (no extra lanes, no post-slice pass).
        out_specs=pl.BlockSpec((tm, action_size), lambda i: (i, 0)),
        compiler_params=pltpu.CompilerParams(
            dimension_semantics=("parallel",),   # v7x: batch across both TCs
            vmem_limit_bytes=vmem_limit),
        cost_estimate=pl.CostEstimate(
            flops=flops,
            transcendentals=batch * action_size,
            bytes_accessed=bytes_accessed),
    )(state, w1, b1, w2, b2, w3, b3)


def init_actor_params(key, state_size, action_size, hidden_sizes=(64, 64),
                      dtype=jnp.float32):
    """Deterministic init mirroring the PyTorch module's reset_parameters():
    hidden-layer weights ~ U(-1/sqrt(fan), 1/sqrt(fan)) where 'fan' is
    weight.size()[0] == out_features (PyTorch quirk, kept intentionally),
    output weights ~ U(-3e-3, 3e-3); biases use PyTorch's default
    U(-1/sqrt(in_features), 1/sqrt(in_features))."""
    sizes = [state_size] + list(hidden_sizes)
    params = []
    for s_in, s_out in zip(sizes[:-1], sizes[1:]):
        key, kw, kb = jax.random.split(key, 3)
        lim_w = 1.0 / jnp.sqrt(jnp.float32(s_out))
        lim_b = 1.0 / jnp.sqrt(jnp.float32(s_in))
        w = jax.random.uniform(kw, (s_in, s_out), jnp.float32, -lim_w, lim_w)
        b = jax.random.uniform(kb, (1, s_out), jnp.float32, -lim_b, lim_b)
        params.extend([w.astype(dtype), b.astype(dtype)])
    key, kw, kb = jax.random.split(key, 3)
    lim_b = 1.0 / jnp.sqrt(jnp.float32(sizes[-1]))
    w_out = jax.random.uniform(kw, (sizes[-1], action_size), jnp.float32,
                               -3e-3, 3e-3)
    b_out = jax.random.uniform(kb, (1, action_size), jnp.float32, -lim_b, lim_b)
    params.extend([w_out.astype(dtype), b_out.astype(dtype)])
    return params


def actor_reference(state, w1, b1, w2, b2, w3, b3):
    f32 = lambda a: a.astype(jnp.float32)
    h1 = jnp.maximum(f32(state) @ f32(w1) + f32(b1), 0.0)
    h2 = jnp.maximum(h1 @ f32(w2) + f32(b2), 0.0)
    return jnp.tanh(h2 @ f32(w3) + f32(b3))


if __name__ == "__main__":
    state_size, action_size = 32, 8
    hidden_sizes = (64, 64)

    key = jax.random.PRNGKey(0)
    key, k_small, k_big, k_rag = jax.random.split(key, 4)
    params = init_actor_params(key, state_size, action_size, hidden_sizes)
    w1, b1, w2, b2, w3, b3 = params

    # --- small demo batch (single grid step) ---
    batch = 8
    state = jax.random.normal(k_small, (batch, state_size), jnp.float32)
    out = jax.block_until_ready(actor_forward(state, w1, b1, w2, b2, w3, b3))
    ref = actor_reference(state, w1, b1, w2, b2, w3, b3)
    assert out.shape == (batch, action_size)
    assert jnp.allclose(out, ref, atol=1e-5, rtol=1e-5)

    # --- larger batch exercising the tiled/pipelined grid path (grid > 1) ---
    big_batch = 256
    state_big = jax.random.normal(k_big, (big_batch, state_size), jnp.float32)
    out_big = jax.block_until_ready(
        actor_forward(state_big, w1, b1, w2, b2, w3, b3, block_rows=64))
    ref_big = actor_reference(state_big, w1, b1, w2, b2, w3, b3)
    assert out_big.shape == (big_batch, action_size)
    assert jnp.allclose(out_big, ref_big, atol=1e-5, rtol=1e-5)

    # --- ragged batch (batch % tm != 0): partial last tile, no pad/slice ---
    rag_batch = 200
    state_rag = jax.random.normal(k_rag, (rag_batch, state_size), jnp.float32)
    out_rag = jax.block_until_ready(
        actor_forward(state_rag, w1, b1, w2, b2, w3, b3, block_rows=64))
    ref_rag = actor_reference(state_rag, w1, b1, w2, b2, w3, b3)
    assert out_rag.shape == (rag_batch, action_size)
    assert jnp.allclose(out_rag, ref_rag, atol=1e-5, rtol=1e-5)

    # --- bf16 weights/activations (v6e/v7x bandwidth path) ---
    bf16 = lambda a: a.astype(jnp.bfloat16)
    out_bf16 = jax.block_until_ready(
        actor_forward(bf16(state_big), *[bf16(p) for p in params],
                      block_rows=64))
    assert jnp.allclose(out_bf16.astype(jnp.float32), ref_big,
                        atol=5e-2, rtol=5e-2)

    print("KERNEL_OK")
</pallas_src>

<mosaic_0001>
module attributes {stable_mosaic.version = 11 : i64} {
  func.func @actor_kernel(%arg0: i32, %arg1: memref<8x32xf32, #tpu.memory_space<vmem>>, %arg2: memref<32x64xf32, #tpu.memory_space<vmem>>, %arg3: memref<1x64xf32, #tpu.memory_space<vmem>>, %arg4: memref<64x64xf32, #tpu.memory_space<vmem>>, %arg5: memref<1x64xf32, #tpu.memory_space<vmem>>, %arg6: memref<64x8xf32, #tpu.memory_space<vmem>>, %arg7: memref<1x8xf32, #tpu.memory_space<vmem>>, %arg8: memref<8x8xf32, #tpu.memory_space<vmem>>) attributes {dimension_semantics = [#tpu.dimension_semantics<parallel>], iteration_bounds = array<i64: 1>, scalar_prefetch = 0 : i64, scratch_operands = 0 : i64, tpu.core_type = #tpu.core_type<tc>, window_params = [{transform_indices = @transform_0, window_bounds = array<i64: 8, 32>}, {pipeline_mode = #tpu.pipeline_mode<synchronous>, transform_indices = @transform_1, window_bounds = array<i64: 32, 64>}, {pipeline_mode = #tpu.pipeline_mode<synchronous>, transform_indices = @transform_2, window_bounds = array<i64: 1, 64>}, {pipeline_mode = #tpu.pipeline_mode<synchronous>, transform_indices = @transform_3, window_bounds = array<i64: 64, 64>}, {pipeline_mode = #tpu.pipeline_mode<synchronous>, transform_indices = @transform_4, window_bounds = array<i64: 1, 64>}, {pipeline_mode = #tpu.pipeline_mode<synchronous>, transform_indices = @transform_5, window_bounds = array<i64: 64, 8>}, {pipeline_mode = #tpu.pipeline_mode<synchronous>, transform_indices = @transform_6, window_bounds = array<i64: 1, 8>}, {transform_indices = @transform_7, window_bounds = array<i64: 8, 8>}]} {
    %c0 = arith.constant 0 : index
    %c0_0 = arith.constant 0 : index
    %0 = vector.load %arg1[%c0, %c0_0] : memref<8x32xf32, #tpu.memory_space<vmem>>, vector<8x32xf32>
    %c0_1 = arith.constant 0 : index
    %c0_2 = arith.constant 0 : index
    %1 = vector.load %arg2[%c0_1, %c0_2] : memref<32x64xf32, #tpu.memory_space<vmem>>, vector<32x64xf32>
    %cst = arith.constant dense<0.000000e+00> : vector<8x64xf32>
    %2 = tpu.matmul %0, %1, %cst {dimension_numbers = #tpu.dot_dimension_numbers<[1], [0], [0], [1], [0, 0, 1, 1], [], []>} : vector<8x32xf32>, vector<32x64xf32>, vector<8x64xf32> -> vector<8x64xf32>
    %c0_3 = arith.constant 0 : index
    %c0_4 = arith.constant 0 : index
    %3 = vector.load %arg3[%c0_3, %c0_4] : memref<1x64xf32, #tpu.memory_space<vmem>>, vector<1x64xf32>
    %4 = vector.broadcast %3 : vector<1x64xf32> to vector<8x64xf32>
    %5 = arith.addf %2, %4 : vector<8x64xf32>
    %cst_5 = arith.constant 0.000000e+00 : f32
    %6 = vector.broadcast %cst_5 : f32 to vector<8x64xf32>
    %7 = arith.maximumf %5, %6 : vector<8x64xf32>
    %c0_6 = arith.constant 0 : index
    %c0_7 = arith.constant 0 : index
    %8 = vector.load %arg4[%c0_6, %c0_7] : memref<64x64xf32, #tpu.memory_space<vmem>>, vector<64x64xf32>
    %cst_8 = arith.constant dense<0.000000e+00> : vector<8x64xf32>
    %9 = tpu.matmul %7, %8, %cst_8 {dimension_numbers = #tpu.dot_dimension_numbers<[1], [0], [0], [1], [0, 0, 1, 1], [], []>} : vector<8x64xf32>, vector<64x64xf32>, vector<8x64xf32> -> vector<8x64xf32>
    %c0_9 = arith.constant 0 : index
    %c0_10 = arith.constant 0 : index
    %10 = vector.load %arg5[%c0_9, %c0_10] : memref<1x64xf32, #tpu.memory_space<vmem>>, vector<1x64xf32>
    %11 = vector.broadcast %10 : vector<1x64xf32> to vector<8x64xf32>
    %12 = arith.addf %9, %11 : vector<8x64xf32>
    %cst_11 = arith.constant 0.000000e+00 : f32
    %13 = vector.broadcast %cst_11 : f32 to vector<8x64xf32>
    %14 = arith.maximumf %12, %13 : vector<8x64xf32>
    %c0_12 = arith.constant 0 : index
    %c0_13 = arith.constant 0 : index
    %15 = vector.load %arg6[%c0_12, %c0_13] : memref<64x8xf32, #tpu.memory_space<vmem>>, vector<64x8xf32>
    %cst_14 = arith.constant dense<0.000000e+00> : vector<8x8xf32>
    %16 = tpu.matmul %14, %15, %cst_14 {dimension_numbers = #tpu.dot_dimension_numbers<[1], [0], [0], [1], [0, 0, 1, 1], [], []>} : vector<8x64xf32>, vector<64x8xf32>, vector<8x8xf32> -> vector<8x8xf32>
    %c0_15 = arith.constant 0 : index
    %c0_16 = arith.constant 0 : index
    %17 = vector.load %arg7[%c0_15, %c0_16] : memref<1x8xf32, #tpu.memory_space<vmem>>, vector<1x8xf32>
    %18 = vector.broadcast %17 : vector<1x8xf32> to vector<8x8xf32>
    %19 = arith.addf %16, %18 : vector<8x8xf32>
    %20 = math.tanh %19 : vector<8x8xf32>
    %c0_17 = arith.constant 0 : index
    %c0_18 = arith.constant 0 : index
    %21 = vector.load %arg8[%c0_17, %c0_18] : memref<8x8xf32, #tpu.memory_space<vmem>>, vector<8x8xf32>
    tpu.vector_store %arg8[%c0_17, %c0_18], %20 {strides = array<i32>} : memref<8x8xf32, #tpu.memory_space<vmem>>, vector<8x8xf32>,
    return
  }
  func.func @transform_0(%arg0: i32) -> (i32, i32) {
    %c0_i32 = arith.constant 0 : i32
    %c0_i32_0 = arith.constant 0 : i32
    return %arg0, %c0_i32 : i32, i32
  }
  func.func @transform_1(%arg0: i32) -> (i32, i32) {
    %c0_i32 = arith.constant 0 : i32
    %c0_i32_0 = arith.constant 0 : i32
    %c0_i32_1 = arith.constant 0 : i32
    return %c0_i32, %c0_i32_0 : i32, i32
  }
  func.func @transform_2(%arg0: i32) -> (i32, i32) {
    %c0_i32 = arith.constant 0 : i32
    %c0_i32_0 = arith.constant 0 : i32
    %c0_i32_1 = arith.constant 0 : i32
    return %c0_i32, %c0_i32_0 : i32, i32
  }
  func.func @transform_3(%arg0: i32) -> (i32, i32) {
    %c0_i32 = arith.constant 0 : i32
    %c0_i32_0 = arith.constant 0 : i32
    %c0_i32_1 = arith.constant 0 : i32
    return %c0_i32, %c0_i32_0 : i32, i32
  }
  func.func @transform_4(%arg0: i32) -> (i32, i32) {
    %c0_i32 = arith.constant 0 : i32
    %c0_i32_0 = arith.constant 0 : i32
    %c0_i32_1 = arith.constant 0 : i32
    return %c0_i32, %c0_i32_0 : i32, i32
  }
  func.func @transform_5(%arg0: i32) -> (i32, i32) {
    %c0_i32 = arith.constant 0 : i32
    %c0_i32_0 = arith.constant 0 : i32
    %c0_i32_1 = arith.constant 0 : i32
    return %c0_i32, %c0_i32_0 : i32, i32
  }
  func.func @transform_6(%arg0: i32) -> (i32, i32) {
    %c0_i32 = arith.constant 0 : i32
    %c0_i32_0 = arith.constant 0 : i32
    %c0_i32_1 = arith.constant 0 : i32
    return %c0_i32, %c0_i32_0 : i32, i32
  }
  func.func @transform_7(%arg0: i32) -> (i32, i32) {
    %c0_i32 = arith.constant 0 : i32
    %c0_i32_0 = arith.constant 0 : i32
    return %arg0, %c0_i32 : i32, i32
  }
}

</mosaic_0001>

<bundles_post_ra>
// kernel: actor_forward.1
= control target key start
LH: loop header
LB: loop body
LE: loop exit
PB: predicated region body
PF: predicated region fallthrough
CT: control target
= control target key end

     0   :  { %12 = vsyncpa [#allocation3], 0  ;;  %s623_s0 = inlined_call_operand.vmem [shape: f32[8,32], index: 0, kind: input, shape index: {}]   ;;  %s624_s1 = inlined_call_operand.hbm [shape: f32[32,64], index: 1, kind: input, shape index: {}]   ;;  %s625_s2 = inlined_call_operand.vmem [shape: f32[1,64], index: 2, kind: input, shape index: {}]   ;;  %s626_s3 = inlined_call_operand.vmem [shape: f32[64,64], index: 3, kind: input, shape index: {}]   ;;  %s627_s4 = inlined_call_operand.vmem [shape: f32[1,64], index: 4, kind: input, shape index: {}]   ;;  %s628_s5 = inlined_call_operand.vmem [shape: f32[64,8], index: 5, kind: input, shape index: {}]   ;;  %s629_s6 = inlined_call_operand.vmem [shape: f32[1,8], index: 6, kind: input, shape index: {}]   ;;  %s630_s7 = inlined_call_operand.hbm [shape: f32[8,8], index: 7, kind: output, shape index: {}]  }
   0x1   :  { %13 = vsyncpa [#allocation4], 0  ;;  %s489_s24 = smov [#allocation2]   ;;  %s441_s28 = scalar_lea.hbm %s624_s1, 512 }
   0x2   :  { %s21_s25 = sshll.u32 %s489_s24, 4  ;;  %p442_p0 = scmp.ne.s32.totalorder %s624_s1, %s441_s28  ;;  %s22_s25 = int_to_ptr.vmem [resolvable:$true] %s21_s25 }
   0x3   :  { %p445_p1 = scmp.lt.u32.totalorder %s441_s28, %s624_s1 }
   0x5   :  { %p447_p2 = pnand %p445_p1, %p442_p0 }
   0x7   :  { %450 = shalt.err (!%p447_p2)
}
   0x8   :  { %s451_s10 = scalar_lea.vmem %s22_s25, 512  ;;  %p456_p4 = scmp.lt.s32.totalorder %s22_s25, %s22_s25 }
   0x9   :  { %p452_p3 = scmp.ne.s32.totalorder %s22_s25, %s451_s10  ;;  %p457_p5 = scmp.lt.s32.totalorder %s451_s10, %s451_s10 }
   0xb   :  { %p458_p6 = por %p457_p5, %p456_p4 }
   0xd   :  { %p459_p7 = pnand %p458_p6, %p452_p3 }
   0xf   :  { %462 = shalt.err (!%p459_p7)
}
  0x10   :  { %s490_s11 = smov 128   ;;  %s491_s12 = smov 8  }
  0x11   :  { %27 = dma.hbm_to_vmem [thread:$0]  %s624_s1, 512, %s22_s25, [#allocation3], %s490_s11, %s490_s11, %s491_s12  }
  0x12   :  { %485 = dma.done.wait [#allocation3], 512  }
  0x13   :  { %486 = vsyncadd [#allocation3], 4294966784  ;;  %v492_v0 = vmov 0.0|0.0   ;;  %vm493_vm0 = vmmov 0   ;;  %v494_v1 = vmov 0.0   ;;  %v42_v2 = vld [vmem:[#allocation2] sm:$0xff] }
  0x14   :  { %402 = vmatprep.subr.bf16.mxu0 %v492_v0  ;;  %361 = vmatprep.mubr.msk.f32.mxu0 %vm493_vm0, %v494_v1  ;;  %v43_v3 = vld [vmem:[#allocation2 + $0x8] sm:$0xff]  ;;  %v44_v4 = vld [vmem:[#allocation2 + $0x10] sm:$0xff]  ;;  %v45_v6 = vld [vmem:[#allocation2 + $0x18] sm:$0xff]  ;;  %vm53_vm1 = vcmask 261120   ;;  %vm143_vm2 = vcmask 523264   ;;  %vm307_vm3 = vcmask 64512  }
  0x15   :  { %408 = vmatprep.subr.bf16.mxu1 %v492_v0  ;;  %380 = vmatprep.mubr.msk.f32.mxu1 %vm493_vm0, %v494_v1  ;;  %v403_v5 = vpack.c.bf16 %v43_v3, %v42_v2  ;;  %v128_v7 = vld [vmem:[%s626_s3] sm:$0xff]  ;;  %v129_v8 = vld [vmem:[%s626_s3 + $0x8] sm:$0xff]  ;;  %v130_v9 = vld [vmem:[%s626_s3 + $0x10] sm:$0xff]  ;;  %v406_v11 = vpack.c.bf16 %v45_v6, %v44_v4 }
  0x16   :  { %v131_v10 = vld [vmem:[%s626_s3 + $0x18] sm:$0xff]  ;;  %v409_v12 = vpack.c.bf16 %v129_v8, %v128_v7  ;;  %v132_v14 = vld [vmem:[%s626_s3 + $0x20] sm:$0xff]  ;;  %v133_v15 = vld [vmem:[%s626_s3 + $0x28] sm:$0xff] }
  0x17   :  { %404 = vmatpush3.bf16.msra.mxu0 %v403_v5  ;;  %v412_v13 = vpack.c.bf16 %v131_v10, %v130_v9  ;;  %v41_v16 = vld [vmem:[%s623_s0] sm:$0xff]  ;;  %v415_v17 = vpack.c.bf16 %v133_v15, %v132_v14  ;;  %v134_v18 = vld [vmem:[%s626_s3 + $0x30] sm:$0xff]  ;;  %v135_v19 = vld [vmem:[%s626_s3 + $0x38] sm:$0xff] }
  0x18   :  { %405 = vmatprep.subr.bf16.mxu0 %v492_v0  ;;  %410 = vmatpush3.bf16.msra.mxu1 %v409_v12  ;;  %v418_v20 = vpack.c.bf16 %v135_v19, %v134_v18  ;;  %v218_v21 = vld [vmem:[%s628_s5] sm:$0xff]  ;;  %v219_v22 = vld [vmem:[%s628_s5 + $0x8] sm:$0xff]  ;;  %v220_v23 = vld [vmem:[%s628_s5 + $0x10] sm:$0xff] }
  0x19   :  { %411 = vmatprep.subr.bf16.mxu1 %v492_v0  ;;  %v421_v24 = vpack.c.bf16 %v219_v22, %v218_v21  ;;  %v221_v25 = vld [vmem:[%s628_s5 + $0x18] sm:$0xff]  ;;  %v222_v27 = vld [vmem:[%s628_s5 + $0x20] sm:$0xff]  ;;  %v223_v28 = vld [vmem:[%s628_s5 + $0x28] sm:$0xff] }
  0x1a   :  { %v424_v26 = vpack.c.bf16 %v221_v25, %v220_v23  ;;  %v427_v29 = vpack.c.bf16 %v223_v28, %v222_v27  ;;  %v324_v30 = vld [vmem:[%s625_s2] ss:$0 sm:$0xff]  ;;  %v224_v35 = vld [vmem:[%s628_s5 + $0x30] sm:$0xff]  ;;  %v225_v36 = vld [vmem:[%s628_s5 + $0x38] sm:$0xff]  ;;  %s495_s5 = smov [#allocation5]  }
  0x1b   :  { %407 = vmatpush3.bf16.msra.mxu0 %v406_v11  ;;  %v430_v37 = vpack.c.bf16 %v225_v36, %v224_v35  ;;  %v326_v38 = vld [vmem:[%s627_s4] ss:$0 sm:$0xff]  ;;  %s315_s27 = sshll.u32 %s495_s5, 4  ;;  %s316_s27 = int_to_ptr.vmem [resolvable:$true] %s315_s27 }
  0x1c   :  { %420 = vmatprep.subr.bf16.mxu0 %v492_v0  ;;  %413 = vmatpush3.bf16.msra.mxu1 %v412_v13  ;;  %v328_v43 = vld [vmem:[%s629_s6] ss:$0 sm:$0xff]  ;;  %s463_s4 = scalar_lea.vmem %s316_s27, 128  ;;  %p468_p9 = scmp.lt.s32.totalorder %s316_s27, %s316_s27 }
  0x1d   :  { %414 = vmatprep.subr.bf16.mxu1 %v492_v0  ;;  %p464_p8 = scmp.ne.s32.totalorder %s316_s27, %s463_s4  ;;  %p469_p10 = scmp.lt.s32.totalorder %s463_s4, %s463_s4 }
  0x1e   :  { %362 = vmatmul.mubr.msk.f32.vlgmr.msra.gmra.mrb[0].mxu0 %vm53_vm1, %v41_v16 }
  0x1f   :  { %399 = vmatprep.mubr.msk.f32.mxu0 %vm493_vm0, %v494_v1  ;;  %422 = vmatpush3.bf16.msra.mxu0 %v421_v24  ;;  %p470_p11 = por %p469_p10, %p468_p9 }
  0x20   :  { %416 = vmatpush3.bf16.msra.mxu1 %v415_v17  ;;  %423 = vmatprep.subr.bf16.mxu0 %v492_v0 }
  0x21   :  { %417 = vmatprep.subr.bf16.mxu1 %v492_v0  ;;  %p471_p12 = pnand %p470_p11, %p464_p8 }
  0x23   :  { %425 = vmatpush3.bf16.msra.mxu0 %v424_v26 }
  0x24   :  { %419 = vmatpush3.bf16.msra.mxu1 %v418_v20  ;;  %426 = vmatprep.subr.bf16.mxu0 %v492_v0 }
  0x27   :  { %428 = vmatpush3.bf16.msra.mxu0 %v427_v29 }
  0x28   :  { %429 = vmatprep.subr.bf16.mxu0 %v492_v0 }
  0x2b   :  { %431 = vmatpush3.bf16.msra.mxu0 %v430_v37 }
  0xf1   :  { %v123_v31 = vpop.f32.mrb[0].mxu0 }
  0xf2   :  { %v124_v32 = vadd.f32 %v324_v30, %v123_v31  ;;  %v363_v33 = vpop.f32.mrb[1].mxu0 }
  0xf4   :  { %v127_v34 = vmax.f32 %v124_v32, 0.0 }
  0xf6   :  { %381 = vmatmul.mubr.msk.f32.vlgmr.msra.gmra.mrb[0].mxu1 %vm143_vm2, %v127_v34 }
 0x1c9   :  { %v213_v39 = vpop.f32.mrb[0].mxu1 }
 0x1ca   :  { %v214_v40 = vadd.f32 %v326_v38, %v213_v39  ;;  %v382_v41 = vpop.f32.mrb[1].mxu1 }
 0x1cc   :  { %v217_v42 = vmax.f32 %v214_v40, 0.0 }
 0x1ce   :  { %400 = vmatmul.mubr.msk.f32.vlgmr.msra.gmra.mrb[2].mxu0 %vm143_vm2, %v217_v42 }
 0x2a1   :  { %v302_v44 = vpop.f32.mrb[2].mxu0 }
 0x2a2   :  { %v303_v45 = vadd.f32 %v328_v43, %v302_v44  ;;  %v401_v46 = vpop.f32.mrb[3].mxu0 }
 0x2a4   :  { %439 = vtanh.f32 %v303_v45 }
 0x2ae   :  { %v440_v47 = vpop.eup %439 }
 0x2af   :  { %308 = vst.msk [vmem:[#allocation5] sm:$0xff] %vm307_vm3, %v440_v47 }
 0x2b0   :  { %474 = shalt.err (!%p471_p12)
}
 0x2b1   :  { %s475_s6 = scalar_lea.hbm %s630_s7, 128 }
 0x2b2   :  { %p476_p13 = scmp.ne.s32.totalorder %s630_s7, %s475_s6  ;;  %p479_p0 = scmp.lt.u32.totalorder %s475_s6, %s630_s7 }
 0x2b4   :  { %p481_p1 = pnand %p479_p0, %p476_p13 }
 0x2b6   :  { %484 = shalt.err (!%p481_p1)
}
 0x2b7   :  { %318 = dma.vmem_to_hbm [thread:$0]  %s316_s27, 128, %s630_s7, [#allocation4]  }
 0x2b8   :  { %487 = dma.done.wait [#allocation4], 128  }
 0x2b9   :  { %488 = vsyncadd [#allocation4], 4294967168 }
 0x2ba   :  { %322 = vsyncpa [#allocation3], 1 }
 0x2bb   :  { %323 = vsyncpa [#allocation4], 1 }

</bundles_post_ra>
